<compile_context>
chip_gen: v6e
topology: v6e:2x2x1
jax: 0.10.0
libtpu: 0.0.40
codegen_flags: <defaults>
</compile_context>

<pallas_src>
import jax
import jax.numpy as jnp
import numpy as np
from jax.experimental import pallas as pl
from jax.experimental.pallas import tpu as pltpu


# ----------------------------------------------------------------------------
# Host-side helpers: decomposition operators and parameter folding.
# ----------------------------------------------------------------------------
def build_moving_avg_matrix(L, kernel_size):
    """Banded matrix reproducing AvgPool1d(k,1,k//2,count_include_pad=False)."""
    if kernel_size % 2 == 0:
        raise ValueError("moving_avg must be odd: PyTorch AvgPool1d with even "
                         "k emits length L+1 and diverges from this kernel.")
    pad = kernel_size // 2
    M = np.zeros((L, L), np.float32)
    for t in range(L):
        lo, hi = max(0, t - pad), min(L, t + pad + 1)
        M[t, lo:hi] = 1.0 / float(hi - lo)
    return jnp.asarray(M)


def fold_parameters(params, L, moving_avg_kernel):
    """Fold decomposition + linear branch surrogates into one weight matrix.

    Returns W of shape (L*C, P*O) with W[l*C+c, p*O+o] = sum_i G_i[p,l]*Wf_i[c,o]
    (G_i = Wt_i @ A_i) and the branch-summed bias flattened to (P*O,).
    Valid only while the three branches are linear surrogates.
    """
    wt, wf, bias = params["wt"], params["wf"], params["bias"]   # (3,P,L),(3,C,O),(3,1,O)
    P, O = wt.shape[1], wf.shape[2]
    C = wf.shape[1]

    M = build_moving_avg_matrix(L, moving_avg_kernel)           # (L, L)
    I = jnp.eye(L, dtype=jnp.float32)
    M2 = M @ M
    A = jnp.stack([M, M - M2, I - 2.0 * M + M2])                # (3, L, L) trend/seasonal/residual

    G = jnp.einsum("ipl,ilm->ipm", wt, A)                       # G_i = Wt_i @ A_i   (3, P, L)
    W = jnp.einsum("ipm,ico->mcpo", G, wf).reshape(L * C, P * O)
    bias_flat = jnp.tile(jnp.sum(bias, axis=0), (P, 1)).reshape(P * O)
    return W, bias_flat, P, O, C


# ----------------------------------------------------------------------------
# Fused kernel: one fat MXU matmul (whole batch) + bias, lane-dense store.
# ----------------------------------------------------------------------------
def fused_kernel(x_ref, w_ref, b_ref, out_ref):
    acc = jnp.dot(x_ref[...], w_ref[...], preferred_element_type=jnp.float32)
    out_ref[...] = (acc + b_ref[...]).astype(out_ref.dtype)


def decomposed_informer_forward(params, x_enc, x_mark_enc, x_dec, x_mark_dec,
                                moving_avg_kernel, matmul_dtype=jnp.bfloat16):
    # TODO(synk): x_mark_enc / x_dec / x_mark_dec are consumed only by the full
    #             Informer branches, which are linear surrogates here.
    del x_mark_enc, x_dec, x_mark_dec
    B, L, C_in = x_enc.shape

    W, bias_flat, P, O, C = fold_parameters(params, L, moving_avg_kernel)
    assert C == C_in
    PO = P * O
    PO_pad = max(128, ((PO + 127) // 128) * 128)     # lane-dense output width
    LC = L * C

    # Wrapper-side layout plumbing (no compute hoisting): flatten (L,C) into
    # the contraction axis, pad output columns to a multiple of 128 lanes,
    # cast MXU operands to bf16 (accumulation stays f32 in the kernel).
    x_mat = x_enc.reshape(B, LC).astype(matmul_dtype)
    w_pad = jnp.pad(W, ((0, 0), (0, PO_pad - PO))).astype(matmul_dtype)
    b_pad = jnp.pad(bias_flat, (0, PO_pad - PO)).reshape(1, PO_pad).astype(jnp.float32)

    bytes_accessed = (x_mat.size * x_mat.dtype.itemsize
                      + w_pad.size * w_pad.dtype.itemsize
                      + b_pad.size * 4 + B * PO_pad * 4)

    out_pad = pl.pallas_call(
        fused_kernel,
        out_shape=jax.ShapeDtypeStruct((B, PO_pad), jnp.float32),
        grid=(1,),                                    # single invocation: whole batch resident
        in_specs=[
            pl.BlockSpec((B, LC), lambda i: (0, 0)),          # x, batch on sublanes
            pl.BlockSpec((LC, PO_pad), lambda i: (0, 0)),     # folded weights
            pl.BlockSpec((1, PO_pad), lambda i: (0, 0)),      # branch-summed bias
        ],
        out_specs=pl.BlockSpec((B, PO_pad), lambda i: (0, 0)),
        compiler_params=pltpu.CompilerParams(
            dimension_semantics=("arbitrary",)),
        cost_estimate=pl.CostEstimate(
            flops=2 * B * LC * PO_pad,
            transcendentals=0,
            bytes_accessed=bytes_accessed),
    )(x_mat, w_pad, b_pad)

    # Slice off the lane padding and restore (B, pred_len, c_out).
    return out_pad[:, :PO].reshape(B, P, O)


# ----------------------------------------------------------------------------
# Pure-JAX reference mirroring the PyTorch module (no folding): explicit
# AvgPool1d decomposition applied twice, then three linear branch predictors.
# ----------------------------------------------------------------------------
def moving_avg_ref(x, k):
    B, L, C = x.shape
    pad = k // 2
    cols = []
    for t in range(L):
        lo, hi = max(0, t - pad), min(L, t + pad + 1)
        cols.append(jnp.mean(x[:, lo:hi, :], axis=1, keepdims=True))
    return jnp.concatenate(cols, axis=1)


if __name__ == "__main__":
    # Small config consistent with the module: seq_len=16, pred_len=8,
    # enc_in=c_out=4, moving_avg=5.
    B, L_enc, C = 2, 16, 4
    pred_len, label_len = 8, 8
    c_out = 4
    moving_avg_kernel = 5

    key = jax.random.PRNGKey(0)
    k1, k2, k3, k4, k5, k6, k7 = jax.random.split(key, 7)
    x_enc = jax.random.normal(k1, (B, L_enc, C), jnp.float32)
    x_mark_enc = jax.random.normal(k2, (B, L_enc, 4), jnp.float32)
    x_dec = jax.random.normal(k3, (B, label_len + pred_len, C), jnp.float32)
    x_mark_dec = jax.random.normal(k4, (B, label_len + pred_len, 4), jnp.float32)

    # Deterministic surrogate parameters for the 3 branch models.
    params = {
        "wt": 0.1 * jax.random.normal(k5, (3, pred_len, L_enc), jnp.float32),
        "wf": 0.1 * jax.random.normal(k6, (3, C, c_out), jnp.float32),
        "bias": 0.01 * jax.random.normal(k7, (3, 1, c_out), jnp.float32),
    }

    out = decomposed_informer_forward(params, x_enc, x_mark_enc, x_dec,
                                      x_mark_dec, moving_avg_kernel)
    out = jax.block_until_ready(out)
    assert out.shape == (B, pred_len, c_out)

    # Un-folded reference: decomposition (twice) + three linear branches.
    trend_r = moving_avg_ref(x_enc, moving_avg_kernel)
    sr_r = x_enc - trend_r
    seasonal_r = moving_avg_ref(sr_r, moving_avg_kernel)
    residual_r = sr_r - seasonal_r

    ref_out = jnp.zeros((B, pred_len, c_out), jnp.float32)
    for i, br in enumerate((trend_r, seasonal_r, residual_r)):
        tmp = jnp.einsum("pl,blc->bpc", params["wt"][i], br)
        ref_out = ref_out + jnp.einsum("bpc,co->bpo", tmp, params["wf"][i]) \
                  + params["bias"][i][None]

    # bf16 MXU operands with f32 accumulation: loose-but-safe tolerance.
    np.testing.assert_allclose(np.asarray(out), np.asarray(ref_out),
                               rtol=2e-2, atol=2e-2)

    print("KERNEL_OK")
</pallas_src>

<mosaic_0001>
module attributes {stable_mosaic.version = 11 : i64} {
  func.func @fused_kernel(%arg0: i32, %arg1: memref<2x64xbf16, #tpu.memory_space<vmem>>, %arg2: memref<64x128xbf16, #tpu.memory_space<vmem>>, %arg3: memref<1x128xf32, #tpu.memory_space<vmem>>, %arg4: memref<2x128xf32, #tpu.memory_space<vmem>>) attributes {dimension_semantics = [#tpu.dimension_semantics<arbitrary>], iteration_bounds = array<i64: 1>, scalar_prefetch = 0 : i64, scratch_operands = 0 : i64, tpu.core_type = #tpu.core_type<tc>, window_params = [{pipeline_mode = #tpu.pipeline_mode<synchronous>, transform_indices = @transform_0, window_bounds = array<i64: 2, 64>}, {pipeline_mode = #tpu.pipeline_mode<synchronous>, transform_indices = @transform_1, window_bounds = array<i64: 64, 128>}, {pipeline_mode = #tpu.pipeline_mode<synchronous>, transform_indices = @transform_2, window_bounds = array<i64: 1, 128>}, {pipeline_mode = #tpu.pipeline_mode<synchronous>, transform_indices = @transform_3, window_bounds = array<i64: 2, 128>}]} {
    %c0 = arith.constant 0 : index
    %c0_0 = arith.constant 0 : index
    %0 = vector.load %arg1[%c0, %c0_0] : memref<2x64xbf16, #tpu.memory_space<vmem>>, vector<2x64xbf16>
    %c0_1 = arith.constant 0 : index
    %c0_2 = arith.constant 0 : index
    %1 = vector.load %arg2[%c0_1, %c0_2] : memref<64x128xbf16, #tpu.memory_space<vmem>>, vector<64x128xbf16>
    %cst = arith.constant dense<0.000000e+00> : vector<2x128xf32>
    %2 = tpu.matmul %0, %1, %cst {dimension_numbers = #tpu.dot_dimension_numbers<[1], [0], [0], [1], [0, 0, 1, 1], [], []>} : vector<2x64xbf16>, vector<64x128xbf16>, vector<2x128xf32> -> vector<2x128xf32>
    %c0_3 = arith.constant 0 : index
    %c0_4 = arith.constant 0 : index
    %3 = vector.load %arg3[%c0_3, %c0_4] : memref<1x128xf32, #tpu.memory_space<vmem>>, vector<1x128xf32>
    %4 = vector.broadcast %3 : vector<1x128xf32> to vector<2x128xf32>
    %5 = arith.addf %2, %4 : vector<2x128xf32>
    %c0_5 = arith.constant 0 : index
    %c0_6 = arith.constant 0 : index
    %6 = vector.load %arg4[%c0_5, %c0_6] : memref<2x128xf32, #tpu.memory_space<vmem>>, vector<2x128xf32>
    tpu.vector_store %arg4[%c0_5, %c0_6], %5 {strides = array<i32>} : memref<2x128xf32, #tpu.memory_space<vmem>>, vector<2x128xf32>,
    return
  }
  func.func @transform_0(%arg0: i32) -> (i32, i32) {
    %c0_i32 = arith.constant 0 : i32
    %c0_i32_0 = arith.constant 0 : i32
    %c0_i32_1 = arith.constant 0 : i32
    return %c0_i32, %c0_i32_0 : i32, i32
  }
  func.func @transform_1(%arg0: i32) -> (i32, i32) {
    %c0_i32 = arith.constant 0 : i32
    %c0_i32_0 = arith.constant 0 : i32
    %c0_i32_1 = arith.constant 0 : i32
    return %c0_i32, %c0_i32_0 : i32, i32
  }
  func.func @transform_2(%arg0: i32) -> (i32, i32) {
    %c0_i32 = arith.constant 0 : i32
    %c0_i32_0 = arith.constant 0 : i32
    %c0_i32_1 = arith.constant 0 : i32
    return %c0_i32, %c0_i32_0 : i32, i32
  }
  func.func @transform_3(%arg0: i32) -> (i32, i32) {
    %c0_i32 = arith.constant 0 : i32
    %c0_i32_0 = arith.constant 0 : i32
    %c0_i32_1 = arith.constant 0 : i32
    return %c0_i32, %c0_i32_0 : i32, i32
  }
}

</mosaic_0001>

<bundles_post_ra>
// kernel: tpu_custom_call.1
= control target key start
LH: loop header
LB: loop body
LE: loop exit
PB: predicated region body
PF: predicated region fallthrough
CT: control target
= control target key end

     0   :  { %8 = vsyncpa [#allocation3], 0  ;;  %s282_s0 = inlined_call_operand.hbm [shape: bf16[2,64], index: 0, kind: input, shape index: {}]   ;;  %s283_s1 = inlined_call_operand.hbm [shape: bf16[64,128], index: 1, kind: input, shape index: {}]   ;;  %s284_s2 = inlined_call_operand.vmem [shape: f32[1,128], index: 2, kind: input, shape index: {}]   ;;  %s285_s3 = inlined_call_operand.hbm [shape: f32[2,128], index: 3, kind: output, shape index: {}]  }
   0x1   :  { %9 = vsyncpa [#allocation6], 0 }
   0x2   :  { %10 = vsyncpa [#allocation4], 0  ;;  %s243_s12 = smov [#allocation2]   ;;  %s244_s14 = smov [#allocation5]  }
   0x3   :  { %s17_s13 = sshll.u32 %s243_s12, 4  ;;  %s26_s15 = sshll.u32 %s244_s14, 4  ;;  %s18_s13 = int_to_ptr.vmem [resolvable:$true] %s17_s13  ;;  %s27_s15 = int_to_ptr.vmem [resolvable:$true] %s26_s15 }
   0x4   :  { %s185_s16 = scalar_lea.vmem %s18_s13, 16  ;;  %s189_s17 = scalar_lea.vmem %s18_s13, 32 }
   0x5   :  { %p186_p0 = scmp.ne.s32.totalorder %s18_s13, %s185_s16  ;;  %p190_p1 = scmp.lt.s32.totalorder %s18_s13, %s18_s13 }
   0x6   :  { %p191_p2 = scmp.lt.s32.totalorder %s189_s17, %s185_s16 }
   0x8   :  { %p192_p3 = por %p191_p2, %p190_p1 }
   0xa   :  { %p193_p4 = pnand %p192_p3, %p186_p0 }
   0xc   :  { %196 = shalt.err (!%p193_p4)
}
   0xd   :  { %20 = dma.hbm_to_vmem [thread:$0]  %s282_s0, 16, %s18_s13, [#allocation3]  }
   0xe   :  { %s205_s20 = scalar_lea.vmem %s27_s15, 512  ;;  %p210_p6 = scmp.lt.s32.totalorder %s27_s15, %s27_s15 }
   0xf   :  { %p206_p5 = scmp.ne.s32.totalorder %s27_s15, %s205_s20  ;;  %p211_p7 = scmp.lt.s32.totalorder %s205_s20, %s205_s20 }
  0x11   :  { %p212_p8 = por %p211_p7, %p210_p6 }
  0x13   :  { %p213_p9 = pnand %p212_p8, %p206_p5 }
  0x15   :  { %216 = shalt.err (!%p213_p9)
}
  0x16   :  { %s245_s21 = smov 64   ;;  %s246_s22 = smov 4  }
  0x17   :  { %32 = dma.hbm_to_vmem [thread:$0]  %s283_s1, 512, %s27_s15, [#allocation6], %s245_s21, %s245_s21, %s246_s22  }
  0x18   :  { %237 = dma.done.wait [#allocation3], 16  }
  0x19   :  { %238 = vsyncadd [#allocation3], 4294967280 }
  0x1a   :  { %239 = dma.done.wait [#allocation6], 512  }
  0x1b   :  { %240 = vsyncadd [#allocation6], 4294966784  ;;  %v247_v0 = vmov 0.0   ;;  %vm248_vm0 = vmmov 0   ;;  %v173_v1 = vld [vmem:[#allocation5 + $0x18] sm:$0xff]   ;;  %v174_v2 = vld [vmem:[#allocation5 + $0x10] sm:$0xff]  }
  0x1c   :  { %154 = vmatprep.subr.bf16.mxu0 %v247_v0  ;;  %162 = vmatprep.mubr.msk.bf16.mxu0 %vm248_vm0, %v247_v0  ;;  %v175_v3 = vld [vmem:[#allocation5 + $0x8] sm:$0xff]   ;;  %v176_v4 = vld [vmem:[#allocation5] sm:$0xff]   ;;  %v42_v5 = vld [vmem:[#allocation2] sm:$0x1]  ;;  %vm82_vm1 = vcmask 523264   ;;  %s249_s25 = smov [#allocation7]  }
  0x1d   :  { %155 = vmatpush3.bf16.msra.mxu0 %v173_v1  ;;  %v143_v6 = vld [vmem:[%s284_s2] ss:$0 sm:$0xff]  ;;  %s133_s26 = sshll.u32 %s249_s25, 4  ;;  %s134_s26 = int_to_ptr.vmem [resolvable:$true] %s133_s26 }
  0x1e   :  { %156 = vmatprep.subr.bf16.mxu0 %v247_v0  ;;  %s217_s27 = scalar_lea.vmem %s134_s26, 32  ;;  %p222_p11 = scmp.lt.s32.totalorder %s134_s26, %s134_s26 }
  0x1f   :  { %p218_p10 = scmp.ne.s32.totalorder %s134_s26, %s217_s27  ;;  %p223_p12 = scmp.lt.s32.totalorder %s217_s27, %s217_s27 }
  0x21   :  { %157 = vmatpush3.bf16.msra.mxu0 %v174_v2  ;;  %p224_p13 = por %p223_p12, %p222_p11 }
  0x22   :  { %158 = vmatprep.subr.bf16.mxu0 %v247_v0 }
  0x23   :  { %p225_p0 = pnand %p224_p13, %p218_p10 }
  0x25   :  { %159 = vmatpush3.bf16.msra.mxu0 %v175_v3 }
  0x26   :  { %160 = vmatprep.subr.bf16.mxu0 %v247_v0 }
  0x29   :  { %161 = vmatpush3.bf16.msra.mxu0 %v176_v4 }
  0x2c   :  { %163 = vmatmul.mubr.msk.bf16.vlgmr.msra.gmra.mxu0 %vm82_vm1, %v42_v5 }
  0xec   :  { %v120_v7 = vpop.f32.mrf.mxu0 }
  0xed   :  { %v121_v8 = vadd.f32 %v143_v6, %v120_v7 }
  0xee   :  { %v164_v9 = vpop.f32.mrf.mxu0 }
  0xef   :  { %126 = vst [vmem:[#allocation7] sm:$0x3] %v121_v8 }
  0xf0   :  { %v123_v10 = vpop.f32.mrf.mxu0 }
  0xf1   :  { %228 = shalt.err (!%p225_p0)
}
  0xf2   :  { %136 = dma.vmem_to_hbm [thread:$0]  %s134_s26, 32, %s285_s3, [#allocation4]   ;;  %v165_v11 = vpop.f32.mrf.mxu0 }
  0xf3   :  { %241 = dma.done.wait [#allocation4], 32  }
  0xf4   :  { %242 = vsyncadd [#allocation4], 4294967264 }
  0xf5   :  { %140 = vsyncpa [#allocation3], 1 }
  0xf6   :  { %141 = vsyncpa [#allocation6], 1 }
  0xf7   :  { %142 = vsyncpa [#allocation4], 1 }

</bundles_post_ra>
